<compile_context>
chip_gen: v5e
topology: v5e:2x2
jax: 0.10.0
libtpu: 0.0.40
codegen_flags: <defaults>
</compile_context>

<pallas_src>
import jax
import jax.numpy as jnp
from jax.experimental import pallas as pl
from jax.experimental.pallas import tpu as pltpu

# ---- demo problem sizes (small, synthetic, lane-dense) ----
D_IN = 128
D_HID = 256
D_OUT = 128
TM_MAX = 1024       # upper bound on the row tile (multiple of 8 sublanes)


def _round_up(n, k):
    return ((n + k - 1) // k) * k


def _pick_tm(m, tm_max=TM_MAX, tm_min=128):
    """Row-tile heuristic: as big as possible (amortize per-step overhead) while
    keeping >=~8 grid steps at large M so both v7x TensorCores stay busy."""
    tm = max(tm_min, min(tm_max, _round_up(pl.cdiv(m, 8), 8)))
    tm = min(tm, _round_up(m, 8))   # never bigger than the (8-aligned) row count
    return tm


def nonlinear_kernel(x_ref, w1_ref, b1_ref, w2_ref, b2_ref, out_ref):
    # x tile -> bf16 MXU operand; accumulate in f32.
    x = x_ref[...].astype(jnp.bfloat16)                               # [TM, D_in]
    h = jnp.dot(x, w1_ref[...], preferred_element_type=jnp.float32) + b1_ref[...]
    # GELU in f32 (tanh approx -> EUP slot; no bf16 cast before the nonlinearity).
    h = jax.nn.gelu(h, approximate=True)                              # [TM, D_hid] f32
    # Second matmul: bf16 operands, f32 accumulation; bias-add in f32.
    out = jnp.dot(h.astype(jnp.bfloat16), w2_ref[...],
                  preferred_element_type=jnp.float32) + b2_ref[...]
    out_ref[...] = out.astype(out_ref.dtype)                          # [TM, D_out]


def nonlinear_forward(x, params, *, tm_max=TM_MAX):
    """Applies layer2(gelu(layer1(x))) over the last axis of x (any leading dims)."""
    # Weights as bf16 MXU operands (cast once, VMEM-resident); biases stay f32.
    w1 = params['w1'].astype(jnp.bfloat16)
    w2 = params['w2'].astype(jnp.bfloat16)
    b1 = params['b1'].astype(jnp.float32).reshape(1, -1)
    b2 = params['b2'].astype(jnp.float32).reshape(1, -1)
    d_in, d_hid = w1.shape
    d_out = w2.shape[1]
    lead = x.shape[:-1]

    x2 = x.reshape(-1, d_in)
    m = x2.shape[0]
    tm = _pick_tm(m, tm_max)
    grid = (pl.cdiv(m, tm),)   # partial last block handled by Pallas (masked store);
                               # garbage rows in that block never reduce across rows.

    out = pl.pallas_call(
        nonlinear_kernel,
        out_shape=jax.ShapeDtypeStruct((m, d_out), x.dtype),
        grid=grid,
        in_specs=[
            pl.BlockSpec((tm, d_in), lambda i: (i, 0)),      # x row tile (streams)
            pl.BlockSpec((d_in, d_hid), lambda i: (0, 0)),   # w1 (resident, bf16)
            pl.BlockSpec((1, d_hid), lambda i: (0, 0)),      # b1 (resident, f32)
            pl.BlockSpec((d_hid, d_out), lambda i: (0, 0)),  # w2 (resident, bf16)
            pl.BlockSpec((1, d_out), lambda i: (0, 0)),      # b2 (resident, f32)
        ],
        out_specs=pl.BlockSpec((tm, d_out), lambda i: (i, 0)),
        compiler_params=pltpu.CompilerParams(
            dimension_semantics=("parallel",)),              # v7x: 2 TCs split rows
    )(x2, w1, b1, w2, b2)

    return out.reshape(*lead, d_out)


def reference_forward(x, params):
    """Pure-JAX reference mirroring NonLinear.forward with the same bf16-operand /
    f32-accumulation math the kernel uses (weights stored [in, out])."""
    w1 = params['w1'].astype(jnp.bfloat16)
    w2 = params['w2'].astype(jnp.bfloat16)
    h = jnp.dot(x.astype(jnp.bfloat16), w1,
                preferred_element_type=jnp.float32) + params['b1']
    h = jax.nn.gelu(h, approximate=True)
    out = jnp.dot(h.astype(jnp.bfloat16), w2,
                  preferred_element_type=jnp.float32) + params['b2']
    return out.astype(x.dtype)


if __name__ == "__main__":
    key = jax.random.PRNGKey(0)
    k_x, k_w1, k_w2 = jax.random.split(key, 3)

    # Input: [batch=2, seq=128, features=128] -> 256 stacked rows, grid of 2 tiles
    # (one per TensorCore on v7x).
    x = jax.random.normal(k_x, (2, 128, D_IN), jnp.float32)

    # Parameters (stored as [in, out], i.e. transposed vs. torch's [out, in]).
    # layer1: 'relu' init (trunc-normal-like scaled normal).
    # layer2: torch 'final' init would zero the weight (trivial output); we use a
    #         scaled-normal init so the correctness check is non-trivial.
    TRUNC_FACTOR = 0.8796256610342398
    std1 = (2.0 / D_IN) ** 0.5 / TRUNC_FACTOR
    params = dict(
        w1=jax.random.normal(k_w1, (D_IN, D_HID), jnp.float32) * std1,
        b1=jnp.zeros((1, D_HID), jnp.float32),
        w2=jax.random.normal(k_w2, (D_HID, D_OUT), jnp.float32) * (D_HID ** -0.5),
        b2=jnp.zeros((1, D_OUT), jnp.float32),
    )

    out = nonlinear_forward(x, params)
    out = jax.block_until_ready(out)

    ref = reference_forward(x, params)
    max_err = float(jnp.max(jnp.abs(out - ref)))
    assert jnp.allclose(out, ref, atol=1e-2, rtol=1e-2), f"max_err={max_err}"
    print("KERNEL_OK")
</pallas_src>

<mosaic_0001>
module attributes {stable_mosaic.version = 11 : i64} {
  func.func @nonlinear_kernel(%arg0: i32, %arg1: memref<128x128xf32, #tpu.memory_space<vmem>>, %arg2: memref<128x256xbf16, #tpu.memory_space<vmem>>, %arg3: memref<1x256xf32, #tpu.memory_space<vmem>>, %arg4: memref<256x128xbf16, #tpu.memory_space<vmem>>, %arg5: memref<1x128xf32, #tpu.memory_space<vmem>>, %arg6: memref<128x128xf32, #tpu.memory_space<vmem>>) attributes {dimension_semantics = [#tpu.dimension_semantics<parallel>], iteration_bounds = array<i64: 2>, scalar_prefetch = 0 : i64, scratch_operands = 0 : i64, tpu.core_type = #tpu.core_type<tc>, window_params = [{transform_indices = @transform_0, window_bounds = array<i64: 128, 128>}, {pipeline_mode = #tpu.pipeline_mode<synchronous>, transform_indices = @transform_1, window_bounds = array<i64: 128, 256>}, {pipeline_mode = #tpu.pipeline_mode<synchronous>, transform_indices = @transform_2, window_bounds = array<i64: 1, 256>}, {pipeline_mode = #tpu.pipeline_mode<synchronous>, transform_indices = @transform_3, window_bounds = array<i64: 256, 128>}, {pipeline_mode = #tpu.pipeline_mode<synchronous>, transform_indices = @transform_4, window_bounds = array<i64: 1, 128>}, {transform_indices = @transform_5, window_bounds = array<i64: 128, 128>}]} {
    %c0 = arith.constant 0 : index
    %c0_0 = arith.constant 0 : index
    %0 = vector.load %arg1[%c0, %c0_0] : memref<128x128xf32, #tpu.memory_space<vmem>>, vector<128x128xf32>
    %1 = arith.truncf %0 : vector<128x128xf32> to vector<128x128xbf16>
    %c0_1 = arith.constant 0 : index
    %c0_2 = arith.constant 0 : index
    %2 = vector.load %arg2[%c0_1, %c0_2] : memref<128x256xbf16, #tpu.memory_space<vmem>>, vector<128x256xbf16>
    %cst = arith.constant dense<0.000000e+00> : vector<128x256xf32>
    %3 = tpu.matmul %1, %2, %cst {dimension_numbers = #tpu.dot_dimension_numbers<[1], [0], [0], [1], [0, 0, 1, 1], [], []>} : vector<128x128xbf16>, vector<128x256xbf16>, vector<128x256xf32> -> vector<128x256xf32>
    %c0_3 = arith.constant 0 : index
    %c0_4 = arith.constant 0 : index
    %4 = vector.load %arg3[%c0_3, %c0_4] : memref<1x256xf32, #tpu.memory_space<vmem>>, vector<1x256xf32>
    %5 = vector.broadcast %4 : vector<1x256xf32> to vector<128x256xf32>
    %6 = arith.addf %3, %5 : vector<128x256xf32>
    %7 = arith.mulf %6, %6 : vector<128x256xf32>
    %8 = arith.mulf %6, %7 : vector<128x256xf32>
    %cst_5 = arith.constant 4.471500e-02 : f32
    %9 = vector.broadcast %cst_5 : f32 to vector<128x256xf32>
    %10 = arith.mulf %9, %8 : vector<128x256xf32>
    %11 = arith.addf %6, %10 : vector<128x256xf32>
    %cst_6 = arith.constant 0.797884583 : f32
    %12 = vector.broadcast %cst_6 : f32 to vector<128x256xf32>
    %13 = arith.mulf %12, %11 : vector<128x256xf32>
    %14 = math.tanh %13 : vector<128x256xf32>
    %cst_7 = arith.constant 1.000000e+00 : f32
    %15 = vector.broadcast %cst_7 : f32 to vector<128x256xf32>
    %16 = arith.addf %15, %14 : vector<128x256xf32>
    %cst_8 = arith.constant 5.000000e-01 : f32
    %17 = vector.broadcast %cst_8 : f32 to vector<128x256xf32>
    %18 = arith.mulf %17, %16 : vector<128x256xf32>
    %19 = arith.mulf %6, %18 : vector<128x256xf32>
    %20 = arith.truncf %19 : vector<128x256xf32> to vector<128x256xbf16>
    %c0_9 = arith.constant 0 : index
    %c0_10 = arith.constant 0 : index
    %21 = vector.load %arg4[%c0_9, %c0_10] : memref<256x128xbf16, #tpu.memory_space<vmem>>, vector<256x128xbf16>
    %cst_11 = arith.constant dense<0.000000e+00> : vector<128x128xf32>
    %22 = tpu.matmul %20, %21, %cst_11 {dimension_numbers = #tpu.dot_dimension_numbers<[1], [0], [0], [1], [0, 0, 1, 1], [], []>} : vector<128x256xbf16>, vector<256x128xbf16>, vector<128x128xf32> -> vector<128x128xf32>
    %c0_12 = arith.constant 0 : index
    %c0_13 = arith.constant 0 : index
    %23 = vector.load %arg5[%c0_12, %c0_13] : memref<1x128xf32, #tpu.memory_space<vmem>>, vector<1x128xf32>
    %24 = vector.broadcast %23 : vector<1x128xf32> to vector<128x128xf32>
    %25 = arith.addf %22, %24 : vector<128x128xf32>
    %c0_14 = arith.constant 0 : index
    %c0_15 = arith.constant 0 : index
    %26 = vector.load %arg6[%c0_14, %c0_15] : memref<128x128xf32, #tpu.memory_space<vmem>>, vector<128x128xf32>
    tpu.vector_store %arg6[%c0_14, %c0_15], %25 {strides = array<i32>} : memref<128x128xf32, #tpu.memory_space<vmem>>, vector<128x128xf32>,
    return
  }
  func.func @transform_0(%arg0: i32) -> (i32, i32) {
    %c0_i32 = arith.constant 0 : i32
    %c0_i32_0 = arith.constant 0 : i32
    return %arg0, %c0_i32 : i32, i32
  }
  func.func @transform_1(%arg0: i32) -> (i32, i32) {
    %c0_i32 = arith.constant 0 : i32
    %c0_i32_0 = arith.constant 0 : i32
    %c0_i32_1 = arith.constant 0 : i32
    return %c0_i32, %c0_i32_0 : i32, i32
  }
  func.func @transform_2(%arg0: i32) -> (i32, i32) {
    %c0_i32 = arith.constant 0 : i32
    %c0_i32_0 = arith.constant 0 : i32
    %c0_i32_1 = arith.constant 0 : i32
    return %c0_i32, %c0_i32_0 : i32, i32
  }
  func.func @transform_3(%arg0: i32) -> (i32, i32) {
    %c0_i32 = arith.constant 0 : i32
    %c0_i32_0 = arith.constant 0 : i32
    %c0_i32_1 = arith.constant 0 : i32
    return %c0_i32, %c0_i32_0 : i32, i32
  }
  func.func @transform_4(%arg0: i32) -> (i32, i32) {
    %c0_i32 = arith.constant 0 : i32
    %c0_i32_0 = arith.constant 0 : i32
    %c0_i32_1 = arith.constant 0 : i32
    return %c0_i32, %c0_i32_0 : i32, i32
  }
  func.func @transform_5(%arg0: i32) -> (i32, i32) {
    %c0_i32 = arith.constant 0 : i32
    %c0_i32_0 = arith.constant 0 : i32
    return %arg0, %c0_i32 : i32, i32
  }
}

</mosaic_0001>

<bundles_post_ra>
// kernel: tpu_custom_call.1
= control target key start
LH: loop header
LB: loop body
LE: loop exit
PB: predicated region body
PF: predicated region fallthrough
CT: control target
= control target key end

     0   :  { %10 = vsyncpa [#allocation3], 0  ;;  %s2210_s0 = inlined_call_operand.hbm [shape: f32[256,128], index: 0, kind: input, shape index: {}]   ;;  %s2211_s1 = inlined_call_operand.hbm [shape: bf16[128,256], index: 1, kind: input, shape index: {}]   ;;  %s2212_s2 = inlined_call_operand.hbm [shape: f32[1,256], index: 2, kind: input, shape index: {}]   ;;  %s2213_s3 = inlined_call_operand.hbm [shape: bf16[256,128], index: 3, kind: input, shape index: {}]   ;;  %s2214_s4 = inlined_call_operand.vmem [shape: f32[1,128], index: 4, kind: input, shape index: {}]   ;;  %s2215_s5 = inlined_call_operand.hbm [shape: f32[256,128], index: 5, kind: output, shape index: {}]  }
   0x1   :  { %12 = vsyncpa [#allocation3 + $0x1], 0 }
   0x2   :  { %13 = vsyncpa [#allocation6], 0 }
   0x3   :  { %14 = vsyncpa [#allocation9], 0 }
   0x4   :  { %15 = vsyncpa [#allocation4], 0 }
   0x5   :  { %17 = vsyncpa [#allocation4 + $0x1], 0  ;;  %s1752_s18 = smov 0   ;;  %s1754_s19 = smov 0  }
   0x6   :  { %s1756_s20 = smov 0   ;;  %s1758_s21 = smov 0  }
   0x7 LB: > { %s1773_s22 = sadd.s32 4294967295, %s1711_s21   ;;  %s1187_s23 = sadd.s32 4294967294, %s1711_s21   ;;  %s1711_s21 = sphi %s1758_s21, %s2228_s21   ;;  %s1707_s20 = sphi %s1756_s20, %s2227_s20   ;;  %s1703_s19 = sphi %s1754_s19, %s2226_s19   ;;  %s1699_s18 = sphi %s1752_s18, %s2225_s18  }
   0x8   : > { %p43_p0 = scmp.ne.s32.totalorder %s1703_s19, %s1699_s18  ;;  %p44_p1 = scmp.eq.s32.totalorder %s1773_s22, 0 }
   0x9   : > { %p151_p2 = scmp.eq.s32.totalorder %s1773_s22, 1  ;;  %p157_p3 = scmp.eq.s32.totalorder %s1187_s23, 1 }
   0xa   : > { %p1782_p4 = por %p44_p1, %p43_p0  ;;  %p1188_p5 = scmp.ge.s32.totalorder %s1711_s21, 1 }
   0xb   : > { %p1787_p6 = por %p157_p3, %p43_p0  ;;  %p164_p7 = scmp.lt.s32.totalorder %s1711_s21, 3 }
   0xc   : > { %s175_s28 = sshll.u32 %s2211_s1, 4  ;;  %s1713_s30 = smov [#allocation5]   ;;  %s176_s28 = int_to_ptr.hbm [resolvable:$true] %s175_s28 }
   0xd   : > { %p1795_p8 = pnand %p1188_p5, %p164_p7  ;;  %s177_s6 = sshll.u32 %s1713_s30, 4  ;;  %s178_s6 = int_to_ptr.vmem [resolvable:$true] %s177_s6 }
   0xe   : > { %s190_s10 = sshll.u32 %s2212_s2, 4  ;;  %s2216_s11 = smov 128   ;;  %s191_s10 = int_to_ptr.hbm [resolvable:$true] %s190_s10 }
   0xf   : > { %p1385_p9 = pneg %p1795_p8  ;;  %s1715_s12 = smov 8  }
  0x10   : > { %s1716_s13 = smov [#allocation7]   ;;  %s201_s17 = sshll.u32 %s2213_s3, 4  ;;  %s202_s17 = int_to_ptr.hbm [resolvable:$true] %s201_s17 }
  0x11   : > { %p1803_p10 = pnand %p1385_p9, %p44_p1  ;;  %s192_s14 = sshll.u32 %s1716_s13, 4  ;;  %s193_s14 = int_to_ptr.vmem [resolvable:$true] %s192_s14 }
  0x12   : > { %s1717_s23 = smov [#allocation8]   ;;  %s1718_s27 = smov 64  }
  0x13   : > { %1388 = dma.hbm_to_vmem [thread:$0]  (!%p1803_p10), %s176_s28, 2048, %s178_s6, [#allocation6], %s2216_s11, %s2216_s11, %s1715_s12  }
  0x14   : > { %1391 = dma.hbm_to_vmem [thread:$0]  (!%p1803_p10), %s191_s10, 32, %s193_s14, [#allocation6]  }
  0x15   : > { %s203_s26 = sshll.u32 %s1717_s23, 4  ;;  %s1719_s28 = smov 4   ;;  %s204_s26 = int_to_ptr.vmem [resolvable:$true] %s203_s26 }
  0x16   : > { %1394 = dma.hbm_to_vmem [thread:$0]  (!%p1803_p10), %s202_s17, 2048, %s204_s26, [#allocation9], %s1718_s27, %s1718_s27, %s1719_s28  }
  0x17   : > { %s1824_s30 = sadd.s32 1, %s1711_s21   ;;  %s30_s8 = sadd.s32 1, %s1707_s20 }
  0x18   : > { %s27_s6 = ssub.s32 %s1711_s21, %s1824_s30  ;;  %p37_p13 = scmp.ne.s32.totalorder %s1707_s20, %s1703_s19 }
  0x19   : > { %p28_p12 = scmp.eq.s32.totalorder %s27_s6, 0  ;;  %p38_p0 = scmp.eq.s32.totalorder %s1711_s21, 0 }
  0x1a   : > { %p1837_p3 = por %p151_p2, %p37_p13  ;;  %p1406_p5 = scmp.lt.s32.totalorder %s1711_s21, 2 }
  0x1b   : > { %s1833_s9 = scalar_select %p28_p12, %s1707_s20, %s30_s8  }
  0x1c   : > { %s220_s13 = sand.u32 1, %s1707_s20   ;;  %s1335_s14 = sshll.u32 %s1711_s21, 7 }
  0x1d   : > { %p39_p7 = por %p38_p0, %p37_p13  ;;  %s1193_s7 = sshll.u32 %s220_s13, 7 }
  0x1e   : > { %s229_s17 = scalar_lea.hbm %s2210_s0, %s1335_s14  ;;  %s224_s26 = scalar_lea.vmem [#allocation2], %s1193_s7 }
  0x1f   : > { %s230_s23 = sshll.u32 %s229_s17, 4  ;;  %s232_s27 = sshll.u32 %s224_s26, 4  ;;  %s231_s23 = int_to_ptr.hbm [resolvable:$true] %s230_s23  ;;  %s233_s27 = int_to_ptr.vmem [resolvable:$true] %s232_s27 }
  0x20   : > { %p1847_p9 = pnand %p1406_p5, %p39_p7  ;;  %s221_s6 = scalar_lea.sflag [#allocation3], %s220_s13 }
  0x21   : > { %s1607_s8 = sshra.s32 %s231_s23, 4  ;;  %s1614_s7 = scalar_lea.hbm %s2210_s0, 256  ;;  %s1608_s8 = int_to_ptr.hbm [resolvable:$true] %s1607_s8 }
  0x22   : > { %s1609_s11 = scalar_lea.hbm %s1608_s8, 128  ;;  %p1611_p10 = pneg %p1847_p9 }
  0x23   : > { %p1610_p2 = scmp.ne.s32.totalorder %s1608_s8, %s1609_s11  ;;  %p1615_p0 = scmp.lt.s32.totalorder %s1608_s8, %s2210_s0 }
  0x24   : > { %p1616_p5 = scmp.lt.s32.totalorder %s1614_s7, %s1609_s11 }
  0x25   : > { %p1612_p12 = pnand %p1611_p10, %p1610_p2 }
  0x26   : > { %p1617_p7 = por %p1616_p5, %p1615_p0 }
  0x27   : > { %p1613_p13 = pneg %p1612_p12 }
  0x29   : > { %p1618_p11 = pnand %p1617_p7, %p1613_p13 }
  0x2b   : > { %1621 = shalt.err (!%p1618_p11)
}
  0x2c   : > { %s2223_s13 = smov 128   ;;  %244 = sbr.rel (%p1795_p8) target bundleno = 509 (0x1fd), region = 40 }
  0x2d   : > { %1398 = dma.hbm_to_vmem [thread:$0]  (!%p1847_p9), %s231_s23, 2048, %s233_s27, %s221_s6, %s2223_s13, %s2223_s13, %s1715_s12  }
  0x2e   : > { %s1867_s26 = sand.u32 (!%p1795_p8), 1, %s1703_s19  }
  0x2f   : > { %s1197_s11 = sshll.u32 (!%p1795_p8), %s1867_s26, 7  ;;  %s247_s8 = scalar_lea.sflag (!%p1795_p8), [#allocation3], %s1867_s26 }
  0x30   : > { %s1873_s14 = scalar_lea.vmem (!%p1795_p8), [#allocation2], %s1197_s11 }
  0x31   : > { %1682 = dma.done.wait (%p1782_p4), %s247_s8, 2048  }
  0x32   : > { %1684 = vsyncadd (%p1782_p4), %s247_s8, 4294965248 }
  0x33   : > { %1686 = dma.done.wait (%p44_p1), [#allocation6], 2080  }
  0x34   : > { %1688 = vsyncadd (%p44_p1), [#allocation6], 4294965216 }
  0x35   : > { %1690 = dma.done.wait (%p44_p1), [#allocation9], 2048  }
  0x36   : > { %1692 = vsyncadd (%p44_p1), [#allocation9], 4294965248  ;;  %v1260_v0 = vld [vmem:[#allocation5 + $0x70] sm:$0xf]  ;;  %v1351_v1 = vld [vmem:[#allocation5 + $0x74] sm:$0xf0] }
  0x37   : > { %v1350_v2 = vld [vmem:[#allocation5 + $0x74] sm:$0xf]  ;;  %v1261_v3 = vor.u32 %v1351_v1, %v1260_v0  ;;  %v1262_v4 = vld [vmem:[#allocation5 + $0x78] sm:$0xf0]  ;;  %v1252_v5 = vld [vmem:[#allocation5 + $0x60] sm:$0xf] }
  0x38   : > { %v1349_v6 = vld [vmem:[#allocation5 + $0x64] sm:$0xf0]  ;;  %v1265_v7 = vor.u32 %v1350_v2, %v1262_v4  ;;  %v1348_v8 = vld [vmem:[#allocation5 + $0x64] sm:$0xf]  ;;  %v1254_v9 = vld [vmem:[#allocation5 + $0x68] sm:$0xf0] }
  0x39   : > { %421 = vmatpush.bf16.msra.mxu0 %v1261_v3  ;;  %v1253_v10 = vor.u32 %v1349_v6, %v1252_v5  ;;  %v1257_v11 = vor.u32 %v1348_v8, %v1254_v9  ;;  %v1244_v12 = vld [vmem:[#allocation5 + $0x50] sm:$0xf]  ;;  %v1347_v13 = vld [vmem:[#allocation5 + $0x54] sm:$0xf0]  ;;  %v1346_v14 = vld [vmem:[#allocation5 + $0x54] sm:$0xf] }
  0x3a   : > { %470 = vmatpush.bf16.msra.mxu1 %v1265_v7  ;;  %v1246_v15 = vld [vmem:[#allocation5 + $0x58] sm:$0xf0]  ;;  %v1245_v16 = vor.u32 %v1347_v13, %v1244_v12  ;;  %v1236_v18 = vld [vmem:[#allocation5 + $0x40] sm:$0xf]  ;;  %v1345_v19 = vld [vmem:[#allocation5 + $0x44] sm:$0xf0] }
  0x3b   : > { %v1249_v17 = vor.u32 %v1346_v14, %v1246_v15  ;;  %v1344_v20 = vld [vmem:[#allocation5 + $0x44] sm:$0xf]  ;;  %v1238_v21 = vld [vmem:[#allocation5 + $0x48] sm:$0xf0]  ;;  %v1237_v22 = vor.u32 %v1345_v19, %v1236_v18  ;;  %v1228_v24 = vld [vmem:[#allocation5 + $0x30] sm:$0xf] }
  0x3c   : > { %v1241_v23 = vor.u32 %v1344_v20, %v1238_v21  ;;  %v1343_v25 = vld [vmem:[#allocation5 + $0x34] sm:$0xf0]  ;;  %v1342_v26 = vld [vmem:[#allocation5 + $0x34] sm:$0xf]  ;;  %v1230_v27 = vld [vmem:[#allocation5 + $0x38] sm:$0xf0] }
  0x3d   : > { %422 = vmatpush.bf16.msra.mxu0 %v1253_v10  ;;  %v1229_v28 = vor.u32 %v1343_v25, %v1228_v24  ;;  %v1233_v29 = vor.u32 %v1342_v26, %v1230_v27  ;;  %v1220_v30 = vld [vmem:[#allocation5 + $0x20] sm:$0xf]  ;;  %v1341_v31 = vld [vmem:[#allocation5 + $0x24] sm:$0xf0]  ;;  %v1340_v32 = vld [vmem:[#allocation5 + $0x24] sm:$0xf] }
  0x3e   : > { %471 = vmatpush.bf16.msra.mxu1 %v1257_v11  ;;  %v1222_v33 = vld [vmem:[#allocation5 + $0x28] sm:$0xf0]  ;;  %v1221_v34 = vor.u32 %v1341_v31, %v1220_v30  ;;  %v1212_v36 = vld [vmem:[#allocation5 + $0x10] sm:$0xf]  ;;  %v1339_v37 = vld [vmem:[#allocation5 + $0x14] sm:$0xf0] }
  0x3f   : > { %v1225_v35 = vor.u32 %v1340_v32, %v1222_v33  ;;  %v1338_v38 = vld [vmem:[#allocation5 + $0x14] sm:$0xf]  ;;  %v1214_v39 = vld [vmem:[#allocation5 + $0x18] sm:$0xf0]  ;;  %v1213_v40 = vor.u32 %v1339_v37, %v1212_v36  ;;  %v1204_v42 = vld [vmem:[#allocation5] sm:$0xf] }
  0x40   : > { %v1217_v41 = vor.u32 %v1338_v38, %v1214_v39  ;;  %v1337_v43 = vld [vmem:[#allocation5 + $0x4] sm:$0xf0]  ;;  %v1336_v44 = vld [vmem:[#allocation5 + $0x4] sm:$0xf]  ;;  %v1206_v45 = vld [vmem:[#allocation5 + $0x8] sm:$0xf0] }
  0x41   : > { %423 = vmatpush.bf16.msra.mxu0 %v1245_v16  ;;  %v1205_v46 = vor.u32 %v1337_v43, %v1204_v42  ;;  %v295_v47 = vld [vmem:[%s1873_s14] sm:$0xff]  ;;  %v296_v48 = vld [vmem:[%s1873_s14 + $0x8] sm:$0xff]  ;;  %v1209_v49 = vor.u32 %v1336_v44, %v1206_v45  ;;  %v297_v51 = vld [vmem:[%s1873_s14 + $0x10] sm:$0xff]  ;;  %s2143_s12 = scalar_lea.vmem [#allocation10], %s1197_s11  ;;  %s1368_s23 = sshll.u32 %s1773_s22, 7 }
  0x42   : > { %472 = vmatpush.bf16.msra.mxu1 %v1249_v17  ;;  %v311_v50 = vpack.c.bf16 %v296_v48, %v295_v47  ;;  %v298_v52 = vld [vmem:[%s1873_s14 + $0x18] sm:$0xff]  ;;  %v299_v54 = vld [vmem:[%s1873_s14 + $0x20] sm:$0xff]  ;;  %v300_v55 = vld [vmem:[%s1873_s14 + $0x28] sm:$0xff]  ;;  %s1081_s6 = scalar_lea.hbm %s2215_s5, %s1368_s23  ;;  %s1082_s15 = sshll.u32 %s2143_s12, 4  ;;  %s1083_s15 = int_to_ptr.vmem [resolvable:$true] %s1082_s15 }
  0x43   : > { %v312_v53 = vpack.c.bf16 %v298_v52, %v297_v51  ;;  %v313_v56 = vpack.c.bf16 %v300_v55, %v299_v54  ;;  %v301_v57 = vld [vmem:[%s1873_s14 + $0x30] sm:$0xff]  ;;  %v302_v58 = vld [vmem:[%s1873_s14 + $0x38] sm:$0xff]  ;;  %v303_v60 = vld [vmem:[%s1873_s14 + $0x40] sm:$0xff]  ;;  %s1084_s7 = sshll.u32 %s1081_s6, 4  ;;  %s1070_s16 = scalar_lea.sflag [#allocation4], %s1867_s26  ;;  %s1085_s7 = int_to_ptr.hbm [resolvable:$true] %s1084_s7 }
  0x44   : > { %v314_v59 = vpack.c.bf16 %v302_v58, %v301_v57  ;;  %v304_v61 = vld [vmem:[%s1873_s14 + $0x48] sm:$0xff]  ;;  %v305_v63 = vld [vmem:[%s1873_s14 + $0x50] sm:$0xff]  ;;  %v306_v0 = vld [vmem:[%s1873_s14 + $0x58] sm:$0xff]  ;;  %s1651_s17 = sshra.s32 %s1085_s7, 4  ;;  %s1657_s8 = scalar_lea.hbm %s2215_s5, 256  ;;  %s1652_s17 = int_to_ptr.hbm [resolvable:$true] %s1651_s17 }
  0x45   : > { %424 = vmatpush.bf16.msra.mxu0 %v1237_v22  ;;  %v315_v62 = vpack.c.bf16 %v304_v61, %v303_v60  ;;  %v316_v1 = vpack.c.bf16 %v306_v0, %v305_v63  ;;  %v307_v2 = vld [vmem:[%s1873_s14 + $0x60] sm:$0xff]  ;;  %v308_v3 = vld [vmem:[%s1873_s14 + $0x68] sm:$0xff]  ;;  %v1358_v7 = vld [vmem:[#allocation8 + $0x30] sm:$0xff]  ;;  %s1653_s22 = scalar_lea.hbm %s1652_s17, 128  ;;  %p1658_p11 = scmp.lt.s32.totalorder %s1652_s17, %s2215_s5 }
  0x46   : > { %473 = vmatpush.bf16.msra.mxu1 %v1241_v23  ;;  %v317_v4 = vpack.c.bf16 %v308_v3, %v307_v2  ;;  %v1359_v5 = vld [vmem:[#allocation8 + $0x38] sm:$0xff]  ;;  %v1366_v8 = vld [vmem:[#allocation8 + $0x70] sm:$0xff]  ;;  %v1357_v11 = vld [vmem:[#allocation8 + $0x28] sm:$0xff]  ;;  %p1654_p1 = scmp.ne.s32.totalorder %s1652_s17, %s1653_s22  ;;  %p1659_p9 = scmp.lt.s32.totalorder %s1657_s8, %s1653_s22 }
  0x47   : > { %v1367_v6 = vld [vmem:[#allocation8 + $0x78] sm:$0xff]  ;;  %955 = vmatpush.bf16.msra.mxu2 %v1359_v5  ;;  %v309_v9 = vld [vmem:[%s1873_s14 + $0x70] sm:$0xff]  ;;  %v1356_v14 = vld [vmem:[#allocation8 + $0x20] sm:$0xff] }
  0x48   : > { %1004 = vmatpush.bf16.msra.mxu3 %v1367_v6  ;;  %v310_v10 = vld [vmem:[%s1873_s14 + $0x78] sm:$0xff]  ;;  %v1365_v12 = vld [vmem:[#allocation8 + $0x68] sm:$0xff]  ;;  %v1364_v15 = vld [vmem:[#allocation8 + $0x60] sm:$0xff]  ;;  %p1655_p4 = pnand %p1654_p1, %p1837_p3  ;;  %p1660_p2 = por %p1659_p9, %p1658_p11 }
  0x49   : > { %425 = vmatpush.bf16.msra.mxu0 %v1229_v28  ;;  %v318_v13 = vpack.c.bf16 %v310_v10, %v309_v9  ;;  %v1355_v16 = vld [vmem:[#allocation8 + $0x18] sm:$0xff]  ;;  %v1354_v18 = vld [vmem:[#allocation8 + $0x10] sm:$0xff]  ;;  %v1353_v21 = vld [vmem:[#allocation8 + $0x8] sm:$0xff] }
  0x4a   : > { %474 = vmatpush.bf16.msra.mxu1 %v1233_v29  ;;  %v1363_v17 = vld [vmem:[#allocation8 + $0x58] sm:$0xff]  ;;  %v1362_v19 = vld [vmem:[#allocation8 + $0x50] sm:$0xff]  ;;  %v1361_v22 = vld [vmem:[#allocation8 + $0x48] sm:$0xff]  ;;  %p1656_p8 = pneg %p1655_p4 }
  0x4b   : > { %956 = vmatpush.bf16.msra.mxu2 %v1358_v7  ;;  %v335_v20 = vld [vmem:[#allocation7] sm:$0x3]  ;;  %v1352_v26 = vld [vmem:[#allocation8] sm:$0xff] }
  0x4c   : > { %1005 = vmatpush.bf16.msra.mxu3 %v1366_v8  ;;  %v1903_v23 = vperm.slane %v335_v20, 0  ;;  %v1905_v24 = vperm.slane %v335_v20, 1  ;;  %v1360_v27 = vld [vmem:[#allocation8 + $0x40] sm:$0xff]  ;;  %p1661_p10 = pnand %p1660_p2, %p1656_p8 }
  0x4d   : > { %426 = vmatpush.bf16.msra.mxu0 %v1221_v34 }
  0x4e   : > { %475 = vmatpush.bf16.msra.mxu1 %v1225_v35 }
  0x4f   : > { %957 = vmatpush.bf16.msra.mxu2 %v1357_v11 }
  0x50   : > { %1006 = vmatpush.bf16.msra.mxu3 %v1365_v12 }
  0x51   : > { %427 = vmatpush.bf16.msra.mxu0 %v1213_v40 }
  0x52   : > { %476 = vmatpush.bf16.msra.mxu1 %v1217_v41 }
  0x53   : > { %958 = vmatpush.bf16.msra.mxu2 %v1356_v14 }
  0x54   : > { %1007 = vmatpush.bf16.msra.mxu3 %v1364_v15 }
  0x55   : > { %428 = vmatpush.bf16.msra.mxu0 %v1205_v46 }
  0x56   : > { %477 = vmatpush.bf16.msra.mxu1 %v1209_v49 }
  0x57   : > { %959 = vmatpush.bf16.msra.mxu2 %v1355_v16 }
  0x58   : > { %429 = vmatmul.bf16.vlgmr.msra.gmra.mxu0 %v311_v50  ;;  %1008 = vmatpush.bf16.msra.mxu3 %v1363_v17 }
  0x59   : > { %478 = vmatmul.bf16.vlgmr.msra.gmra.mxu1 %v311_v50 }
  0x5b   : > { %960 = vmatpush.bf16.msra.mxu2 %v1354_v18 }
  0x5c   : > { %1009 = vmatpush.bf16.msra.mxu3 %v1362_v19 }
  0x5f   : > { %961 = vmatpush.bf16.msra.mxu2 %v1353_v21 }
  0x60   : > { %1010 = vmatpush.bf16.msra.mxu3 %v1361_v22 }
  0x63   : > { %962 = vmatpush.bf16.msra.mxu2 %v1352_v26 }
  0x64   : > { %1011 = vmatpush.bf16.msra.mxu3 %v1360_v27 }
  0x68   : > { %434 = vmatmul.bf16.gmra.mxu0 %v312_v53 }
  0x69   : > { %483 = vmatmul.bf16.gmra.mxu1 %v312_v53 }
  0x78   : > { %439 = vmatmul.bf16.gmra.mxu0 %v313_v56 }
  0x79   : > { %488 = vmatmul.bf16.gmra.mxu1 %v313_v56 }
  0x88   : > { %444 = vmatmul.bf16.gmra.mxu0 %v314_v59 }
  0x89   : > { %493 = vmatmul.bf16.gmra.mxu1 %v314_v59 }
  0x98   : > { %449 = vmatmul.bf16.gmra.mxu0 %v315_v62 }
  0x99   : > { %498 = vmatmul.bf16.gmra.mxu1 %v315_v62 }
  0xa8   : > { %454 = vmatmul.bf16.gmra.mxu0 %v316_v1 }
  0xa9   : > { %503 = vmatmul.bf16.gmra.mxu1 %v316_v1 }
  0xb8   : > { %459 = vmatmul.bf16.gmra.mxu0 %v317_v4 }
  0xb9   : > { %508 = vmatmul.bf16.gmra.mxu1 %v317_v4 }
  0xc8   : > { %464 = vmatmul.bf16.gmra.mxu0 %v318_v13 }
  0xc9   : > { %513 = vmatmul.bf16.gmra.mxu1 %v318_v13 }
  0xd5   : > { %v430_v25 = vpop.f32.mrf.mxu0 }
  0xd6   : > { %v1908_v28 = vadd.f32 %v430_v25, %v1903_v23  ;;  %v479_v29 = vpop.f32.mrf.mxu1 }
  0xd7   : > { %v1911_v30 = vadd.f32 %v479_v29, %v1905_v24 }
  0xd8   : > { %v519_v31 = vmul.f32 %v1908_v28, %v1908_v28 }
  0xd9   : > { %v520_v32 = vmul.f32 %v1911_v30, %v1911_v30 }
  0xda   : > { %v551_v33 = vmul.f32 %v519_v31, %v1908_v28 }
  0xdb   : > { %v552_v34 = vmul.f32 %v520_v32, %v1911_v30 }
  0xdc   : > { %v583_v35 = vmul.f32 0.044715, %v551_v33 }
  0xdd   : > { %v584_v36 = vmul.f32 0.044715, %v552_v34  ;;  %v432_v37 = vpop.f32.mrf.mxu0 }
  0xde   : > { %v615_v38 = vadd.f32 %v583_v35, %v1908_v28  ;;  %v433_v39 = vadd.f32 %v432_v37, %v1903_v23  ;;  %v481_v40 = vpop.f32.mrf.mxu1 }
  0xdf   : > { %v616_v41 = vadd.f32 %v584_v36, %v1911_v30  ;;  %v482_v42 = vadd.f32 %v481_v40, %v1905_v24 }
  0xe0   : > { %v521_v43 = vmul.f32 %v433_v39, %v433_v39  ;;  %v647_v44 = vmul.f32 0.7978846, %v615_v38 }
  0xe1   : > { %v522_v45 = vmul.f32 %v482_v42, %v482_v42  ;;  %v648_v46 = vmul.f32 0.7978846, %v616_v41 }
  0xe2   : > { %v553_v47 = vmul.f32 %v521_v43, %v433_v39  ;;  %1453 = vtanh.f32 %v647_v44 }
  0xe3   : > { %v554_v48 = vmul.f32 %v522_v45, %v482_v42  ;;  %1455 = vtanh.f32 %v648_v46 }
  0xe4   : > { %v585_v49 = vmul.f32 0.044715, %v553_v47 }
  0xe5   : > { %v586_v50 = vmul.f32 0.044715, %v554_v48  ;;  %v435_v51 = vpop.f32.mrf.mxu0 }
  0xe6   : > { %v617_v52 = vadd.f32 %v585_v49, %v433_v39  ;;  %v1924_v53 = vadd.f32 %v435_v51, %v1903_v23  ;;  %v484_v54 = vpop.f32.mrf.mxu1 }
  0xe7   : > { %v618_v55 = vadd.f32 %v586_v50, %v482_v42  ;;  %v1927_v56 = vadd.f32 %v484_v54, %v1905_v24 }
  0xe8   : > { %v523_v57 = vmul.f32 %v1924_v53, %v1924_v53  ;;  %v649_v58 = vmul.f32 0.7978846, %v617_v52  ;;  %v1454_v61 = vpop.eup %1453 }
  0xe9   : > { %v524_v59 = vmul.f32 %v1927_v56, %v1927_v56  ;;  %v650_v60 = vmul.f32 0.7978846, %v618_v55  ;;  %v1456_v63 = vpop.eup %1455  ;;  %v711_v4 = vadd.f32 1.0, %v1454_v61 }
  0xea   : > { %v555_v62 = vmul.f32 %v523_v57, %v1924_v53  ;;  %1457 = vtanh.f32 %v649_v58  ;;  %v712_v8 = vadd.f32 1.0, %v1456_v63 }
  0xeb   : > { %v556_v0 = vmul.f32 %v524_v59, %v1927_v56  ;;  %1459 = vtanh.f32 %v650_v60  ;;  %v743_v17 = vmul.f32 0.5, %v711_v4 }
  0xec   : > { %v587_v1 = vmul.f32 0.044715, %v555_v62  ;;  %v744_v21 = vmul.f32 0.5, %v712_v8 }
  0xed   : > { %v588_v2 = vmul.f32 0.044715, %v556_v0  ;;  %v437_v3 = vpop.f32.mrf.mxu0  ;;  %v775_v32 = vmul.f32 %v743_v17, %v1908_v28 }
  0xee   : > { %v619_v5 = vadd.f32 %v587_v1, %v1924_v53  ;;  %v1937_v6 = vadd.f32 %v437_v3, %v1903_v23  ;;  %v486_v7 = vpop.f32.mrf.mxu1  ;;  %v776_v37 = vmul.f32 %v744_v21, %v1911_v30 }
  0xef   : > { %v620_v9 = vadd.f32 %v588_v2, %v1927_v56  ;;  %v1941_v10 = vadd.f32 %v486_v7, %v1905_v24 }
  0xf0   : > { %v1458_v11 = vpop.eup %1457  ;;  %v525_v12 = vmul.f32 %v1937_v6, %v1937_v6  ;;  %v651_v13 = vmul.f32 0.7978846, %v619_v5 }
  0xf1   : > { %v1460_v14 = vpop.eup %1459  ;;  %v526_v15 = vmul.f32 %v1941_v10, %v1941_v10  ;;  %v713_v16 = vadd.f32 1.0, %v1458_v11  ;;  %v652_v18 = vmul.f32 0.7978846, %v620_v9 }
  0xf2   : > { %v557_v19 = vmul.f32 %v525_v12, %v1937_v6  ;;  %v714_v20 = vadd.f32 1.0, %v1460_v14  ;;  %1461 = vtanh.f32 %v651_v13 }
  0xf3   : > { %v558_v22 = vmul.f32 %v526_v15, %v1941_v10  ;;  %v745_v25 = vmul.f32 0.5, %v713_v16  ;;  %1463 = vtanh.f32 %v652_v18 }
  0xf4   : > { %v589_v26 = vmul.f32 0.044715, %v557_v19  ;;  %v746_v27 = vmul.f32 0.5, %v714_v20 }
  0xf5   : > { %v590_v29 = vmul.f32 0.044715, %v558_v22  ;;  %v440_v31 = vpop.f32.mrf.mxu0  ;;  %v777_v33 = vmul.f32 %v745_v25, %v433_v39 }
  0xf6   : > { %v621_v34 = vadd.f32 %v589_v26, %v1937_v6  ;;  %v1952_v35 = vadd.f32 %v440_v31, %v1903_v23  ;;  %v489_v36 = vpop.f32.mrf.mxu1  ;;  %v778_v38 = vmul.f32 %v746_v27, %v482_v42 }
  0xf7   : > { %v622_v40 = vadd.f32 %v590_v29, %v1941_v10  ;;  %v1957_v41 = vadd.f32 %v489_v36, %v1905_v24  ;;  %v807_v43 = vpack.c.bf16 %v777_v33, %v775_v32 }
  0xf8   : > { %v527_v28 = vmul.f32 %v1952_v35, %v1952_v35  ;;  %v808_v39 = vpack.c.bf16 %v778_v38, %v776_v37  ;;  %v653_v44 = vmul.f32 0.7978846, %v621_v34  ;;  %v1462_v47 = vpop.eup %1461 }
  0xf9   : > { %v528_v45 = vmul.f32 %v1957_v41, %v1957_v41  ;;  %963 = vmatmul.bf16.vlgmr.msra.gmra.mxu2 %v807_v43  ;;  %v654_v46 = vmul.f32 0.7978846, %v622_v40  ;;  %v1464_v42 = vpop.eup %1463  ;;  %v715_v52 = vadd.f32 1.0, %v1462_v47 }
  0xfa   : > { %v559_v30 = vmul.f32 %v527_v28, %v1952_v35  ;;  %1012 = vmatmul.bf16.vlgmr.msra.gmra.mxu3 %v808_v39  ;;  %1465 = vtanh.f32 %v653_v44  ;;  %v716_v58 = vadd.f32 1.0, %v1464_v42 }
  0xfb   : > { %v560_v48 = vmul.f32 %v528_v45, %v1957_v41  ;;  %1467 = vtanh.f32 %v654_v46  ;;  %v747_v3 = vmul.f32 0.5, %v715_v52 }
  0xfc   : > { %v591_v49 = vmul.f32 0.044715, %v559_v30  ;;  %v748_v8 = vmul.f32 0.5, %v716_v58 }
  0xfd   : > { %v592_v50 = vmul.f32 0.044715, %v560_v48  ;;  %v442_v51 = vpop.f32.mrf.mxu0  ;;  %v779_v16 = vmul.f32 %v747_v3, %v1924_v53 }
  0xfe   : > { %v623_v54 = vadd.f32 %v591_v49, %v1952_v35  ;;  %v1967_v55 = vadd.f32 %v442_v51, %v1903_v23  ;;  %v491_v57 = vpop.f32.mrf.mxu1  ;;  %v780_v21 = vmul.f32 %v748_v8, %v1927_v56 }
  0xff   : > { %v624_v59 = vadd.f32 %v592_v50, %v1957_v41  ;;  %v1971_v60 = vadd.f32 %v491_v57, %v1905_v24 }
 0x100   : > { %v1466_v61 = vpop.eup %1465  ;;  %v529_v62 = vmul.f32 %v1967_v55, %v1967_v55  ;;  %v655_v63 = vmul.f32 0.7978846, %v623_v54 }
 0x101   : > { %v1468_v0 = vpop.eup %1467  ;;  %v530_v1 = vmul.f32 %v1971_v60, %v1971_v60  ;;  %v717_v2 = vadd.f32 1.0, %v1466_v61  ;;  %v656_v4 = vmul.f32 0.7978846, %v624_v59 }
 0x102   : > { %v561_v5 = vmul.f32 %v529_v62, %v1967_v55  ;;  %v718_v7 = vadd.f32 1.0, %v1468_v0  ;;  %1469 = vtanh.f32 %v655_v63 }
 0x103   : > { %v562_v9 = vmul.f32 %v530_v1, %v1971_v60  ;;  %v749_v11 = vmul.f32 0.5, %v717_v2  ;;  %1471 = vtanh.f32 %v656_v4 }
 0x104   : > { %v593_v12 = vmul.f32 0.044715, %v561_v5  ;;  %v750_v13 = vmul.f32 0.5, %v718_v7 }
 0x105   : > { %v594_v14 = vmul.f32 0.044715, %v562_v9  ;;  %v445_v15 = vpop.f32.mrf.mxu0  ;;  %v781_v17 = vmul.f32 %v749_v11, %v1937_v6 }
 0x106   : > { %v625_v18 = vadd.f32 %v593_v12, %v1967_v55  ;;  %v1983_v19 = vadd.f32 %v445_v15, %v1903_v23  ;;  %v494_v20 = vpop.f32.mrf.mxu1  ;;  %v782_v22 = vmul.f32 %v750_v13, %v1941_v10 }
 0x107   : > { %v626_v25 = vadd.f32 %v594_v14, %v1971_v60  ;;  %v1989_v26 = vadd.f32 %v494_v20, %v1905_v24  ;;  %v809_v27 = vpack.c.bf16 %v781_v17, %v779_v16 }
 0x108   : > { %v531_v53 = vmul.f32 %v1983_v19, %v1983_v19  ;;  %v810_v6 = vpack.c.bf16 %v782_v22, %v780_v21  ;;  %v657_v29 = vmul.f32 0.7978846, %v625_v18  ;;  %v1470_v33 = vpop.eup %1469 }
 0x109   : > { %v532_v31 = vmul.f32 %v1989_v26, %v1989_v26  ;;  %968 = vmatmul.bf16.gmra.mxu2 %v809_v27  ;;  %v658_v32 = vmul.f32 0.7978846, %v626_v25  ;;  %v1472_v10 = vpop.eup %1471  ;;  %v719_v40 = vadd.f32 1.0, %v1470_v33 }
 0x10a   : > { %v563_v56 = vmul.f32 %v531_v53, %v1983_v19  ;;  %1017 = vmatmul.bf16.gmra.mxu3 %v810_v6  ;;  %1473 = vtanh.f32 %v657_v29  ;;  %v720_v44 = vadd.f32 1.0, %v1472_v10 }
 0x10b   : > { %v564_v34 = vmul.f32 %v532_v31, %v1989_v26  ;;  %1475 = vtanh.f32 %v658_v32  ;;  %v751_v51 = vmul.f32 0.5, %v719_v40 }
 0x10c   : > { %v595_v36 = vmul.f32 0.044715, %v563_v56  ;;  %v752_v58 = vmul.f32 0.5, %v720_v44 }
 0x10d   : > { %v596_v37 = vmul.f32 0.044715, %v564_v34  ;;  %v447_v38 = vpop.f32.mrf.mxu0  ;;  %v783_v2 = vmul.f32 %v751_v51, %v1952_v35 }
 0x10e   : > { %v627_v43 = vadd.f32 %v595_v36, %v1983_v19  ;;  %v1999_v28 = vadd.f32 %v447_v38, %v1903_v23  ;;  %v496_v39 = vpop.f32.mrf.mxu1  ;;  %v784_v8 = vmul.f32 %v752_v58, %v1957_v41 }
 0x10f   : > { %v628_v45 = vadd.f32 %v596_v37, %v1989_v26  ;;  %v2003_v46 = vadd.f32 %v496_v39, %v1905_v24 }
 0x110   : > { %v1474_v47 = vpop.eup %1473  ;;  %v533_v30 = vmul.f32 %v1999_v28, %v1999_v28  ;;  %v659_v42 = vmul.f32 0.7978846, %v627_v43 }
 0x111   : > { %v1476_v48 = vpop.eup %1475  ;;  %v534_v49 = vmul.f32 %v2003_v46, %v2003_v46  ;;  %v721_v50 = vadd.f32 1.0, %v1474_v47  ;;  %v660_v52 = vmul.f32 0.7978846, %v628_v45 }
 0x112   : > { %v565_v54 = vmul.f32 %v533_v30, %v1999_v28  ;;  %v722_v57 = vadd.f32 1.0, %v1476_v48  ;;  %1477 = vtanh.f32 %v659_v42 }
 0x113   : > { %v566_v59 = vmul.f32 %v534_v49, %v2003_v46  ;;  %v753_v61 = vmul.f32 0.5, %v721_v50  ;;  %1479 = vtanh.f32 %v660_v52 }
 0x114   : > { %v597_v62 = vmul.f32 0.044715, %v565_v54  ;;  %v754_v63 = vmul.f32 0.5, %v722_v57 }
 0x115   : > { %v598_v0 = vmul.f32 0.044715, %v566_v59  ;;  %v450_v1 = vpop.f32.mrf.mxu0  ;;  %v785_v3 = vmul.f32 %v753_v61, %v1967_v55 }
 0x116   : > { %v629_v4 = vadd.f32 %v597_v62, %v1999_v28  ;;  %v2015_v5 = vadd.f32 %v450_v1, %v1903_v23  ;;  %v499_v7 = vpop.f32.mrf.mxu1  ;;  %v786_v9 = vmul.f32 %v754_v63, %v1971_v60 }
 0x117   : > { %v630_v11 = vadd.f32 %v598_v0, %v2003_v46  ;;  %v2021_v12 = vadd.f32 %v499_v7, %v1905_v24  ;;  %v811_v13 = vpack.c.bf16 %v785_v3, %v783_v2 }
 0x118   : > { %v535_v35 = vmul.f32 %v2015_v5, %v2015_v5  ;;  %v812_v55 = vpack.c.bf16 %v786_v9, %v784_v8  ;;  %v661_v14 = vmul.f32 0.7978846, %v629_v4  ;;  %v1478_v17 = vpop.eup %1477 }
 0x119   : > { %v536_v15 = vmul.f32 %v2021_v12, %v2021_v12  ;;  %973 = vmatmul.bf16.gmra.mxu2 %v811_v13  ;;  %v662_v16 = vmul.f32 0.7978846, %v630_v11  ;;  %v1480_v60 = vpop.eup %1479  ;;  %v723_v25 = vadd.f32 1.0, %v1478_v17 }
 0x11a   : > { %v567_v41 = vmul.f32 %v535_v35, %v2015_v5  ;;  %1022 = vmatmul.bf16.gmra.mxu3 %v812_v55  ;;  %1481 = vtanh.f32 %v661_v14  ;;  %v724_v29 = vadd.f32 1.0, %v1480_v60 }
 0x11b   : > { %v568_v18 = vmul.f32 %v536_v15, %v2021_v12  ;;  %1483 = vtanh.f32 %v662_v16  ;;  %v755_v38 = vmul.f32 0.5, %v723_v25 }
 0x11c   : > { %v599_v20 = vmul.f32 0.044715, %v567_v41  ;;  %v756_v44 = vmul.f32 0.5, %v724_v29 }
 0x11d   : > { %v600_v21 = vmul.f32 0.044715, %v568_v18  ;;  %v452_v22 = vpop.f32.mrf.mxu0  ;;  %v787_v50 = vmul.f32 %v755_v38, %v1983_v19 }
 0x11e   : > { %v631_v27 = vadd.f32 %v599_v20, %v2015_v5  ;;  %v2031_v53 = vadd.f32 %v452_v22, %v1903_v23  ;;  %v501_v6 = vpop.f32.mrf.mxu1  ;;  %v788_v58 = vmul.f32 %v756_v44, %v1989_v26 }
 0x11f   : > { %v632_v31 = vadd.f32 %v600_v21, %v2021_v12  ;;  %v2035_v32 = vadd.f32 %v501_v6, %v1905_v24 }
 0x120   : > { %v1482_v33 = vpop.eup %1481  ;;  %v537_v56 = vmul.f32 %v2031_v53, %v2031_v53  ;;  %v663_v10 = vmul.f32 0.7978846, %v631_v27 }
 0x121   : > { %v1484_v34 = vpop.eup %1483  ;;  %v538_v36 = vmul.f32 %v2035_v32, %v2035_v32  ;;  %v725_v37 = vadd.f32 1.0, %v1482_v33  ;;  %v664_v40 = vmul.f32 0.7978846, %v632_v31 }
 0x122   : > { %v569_v43 = vmul.f32 %v537_v56, %v2031_v53  ;;  %v726_v39 = vadd.f32 1.0, %v1484_v34  ;;  %1485 = vtanh.f32 %v663_v10 }
 0x123   : > { %v570_v45 = vmul.f32 %v538_v36, %v2035_v32  ;;  %v757_v47 = vmul.f32 0.5, %v725_v37  ;;  %1487 = vtanh.f32 %v664_v40 }
 0x124   : > { %v601_v30 = vmul.f32 0.044715, %v569_v43  ;;  %v758_v42 = vmul.f32 0.5, %v726_v39 }
 0x125   : > { %v602_v48 = vmul.f32 0.044715, %v570_v45  ;;  %v455_v49 = vpop.f32.mrf.mxu0  ;;  %v789_v51 = vmul.f32 %v757_v47, %v1999_v28 }
 0x126   : > { %v633_v52 = vadd.f32 %v601_v30, %v2031_v53  ;;  %v2047_v54 = vadd.f32 %v455_v49, %v1903_v23  ;;  %v504_v57 = vpop.f32.mrf.mxu1  ;;  %v790_v59 = vmul.f32 %v758_v42, %v2003_v46 }
 0x127   : > { %v634_v61 = vadd.f32 %v602_v48, %v2035_v32  ;;  %v2053_v62 = vadd.f32 %v504_v57, %v1905_v24  ;;  %v813_v63 = vpack.c.bf16 %v789_v51, %v787_v50 }
 0x128   : > { %v539_v19 = vmul.f32 %v2047_v54, %v2047_v54  ;;  %v814_v28 = vpack.c.bf16 %v790_v59, %v788_v58  ;;  %v665_v0 = vmul.f32 0.7978846, %v633_v52  ;;  %v1486_v3 = vpop.eup %1485 }
 0x129   : > { %v540_v1 = vmul.f32 %v2053_v62, %v2053_v62  ;;  %978 = vmatmul.bf16.gmra.mxu2 %v813_v63  ;;  %v666_v2 = vmul.f32 0.7978846, %v634_v61  ;;  %v1488_v46 = vpop.eup %1487  ;;  %v727_v11 = vadd.f32 1.0, %v1486_v3 }
 0x12a   : > { %v571_v26 = vmul.f32 %v539_v19, %v2047_v54  ;;  %1027 = vmatmul.bf16.gmra.mxu3 %v814_v28  ;;  %1489 = vtanh.f32 %v665_v0  ;;  %v728_v14 = vadd.f32 1.0, %v1488_v46 }
 0x12b   : > { %v572_v4 = vmul.f32 %v540_v1, %v2053_v62  ;;  %1491 = vtanh.f32 %v666_v2  ;;  %v759_v22 = vmul.f32 0.5, %v727_v11 }
 0x12c   : > { %v603_v7 = vmul.f32 0.044715, %v571_v26  ;;  %v760_v29 = vmul.f32 0.5, %v728_v14 }
 0x12d   : > { %v604_v8 = vmul.f32 0.044715, %v572_v4  ;;  %v457_v9 = vpop.f32.mrf.mxu0  ;;  %v791_v37 = vmul.f32 %v759_v22, %v2015_v5 }
 0x12e   : > { %v635_v13 = vadd.f32 %v603_v7, %v2047_v54  ;;  %v2063_v35 = vadd.f32 %v457_v9, %v1903_v23  ;;  %v506_v55 = vpop.f32.mrf.mxu1  ;;  %v792_v44 = vmul.f32 %v760_v29, %v2021_v12 }
 0x12f   : > { %v636_v15 = vadd.f32 %v604_v8, %v2053_v62  ;;  %v2067_v16 = vadd.f32 %v506_v55, %v1905_v24 }
 0x130   : > { %v1490_v17 = vpop.eup %1489  ;;  %v541_v41 = vmul.f32 %v2063_v35, %v2063_v35  ;;  %v667_v60 = vmul.f32 0.7978846, %v635_v13 }
 0x131   : > { %v1492_v18 = vpop.eup %1491  ;;  %v542_v20 = vmul.f32 %v2067_v16, %v2067_v16  ;;  %v729_v21 = vadd.f32 1.0, %v1490_v17  ;;  %v668_v25 = vmul.f32 0.7978846, %v636_v15 }
 0x132   : > { %v573_v27 = vmul.f32 %v541_v41, %v2063_v35  ;;  %v730_v6 = vadd.f32 1.0, %v1492_v18  ;;  %1493 = vtanh.f32 %v667_v60 }
 0x133   : > { %v574_v31 = vmul.f32 %v542_v20, %v2067_v16  ;;  %v761_v33 = vmul.f32 0.5, %v729_v21  ;;  %1495 = vtanh.f32 %v668_v25 }
 0x134   : > { %v605_v56 = vmul.f32 0.044715, %v573_v27  ;;  %v762_v10 = vmul.f32 0.5, %v730_v6 }
 0x135   : > { %v606_v34 = vmul.f32 0.044715, %v574_v31  ;;  %v460_v36 = vpop.f32.mrf.mxu0  ;;  %v793_v38 = vmul.f32 %v761_v33, %v2031_v53 }
 0x136   : > { %v637_v40 = vadd.f32 %v605_v56, %v2063_v35  ;;  %v2079_v43 = vadd.f32 %v460_v36, %v1903_v23  ;;  %v509_v39 = vpop.f32.mrf.mxu1  ;;  %v794_v45 = vmul.f32 %v762_v10, %v2035_v32 }
 0x137   : > { %v638_v47 = vadd.f32 %v606_v34, %v2067_v16  ;;  %v2085_v30 = vadd.f32 %v509_v39, %v1905_v24  ;;  %v815_v42 = vpack.c.bf16 %v793_v38, %v791_v37 }
 0x138   : > { %v543_v5 = vmul.f32 %v2079_v43, %v2079_v43  ;;  %v816_v53 = vpack.c.bf16 %v794_v45, %v792_v44  ;;  %v669_v48 = vmul.f32 0.7978846, %v637_v40  ;;  %v1494_v51 = vpop.eup %1493 }
 0x139   : > { %v544_v49 = vmul.f32 %v2085_v30, %v2085_v30  ;;  %983 = vmatmul.bf16.gmra.mxu2 %v815_v42  ;;  %v670_v50 = vmul.f32 0.7978846, %v638_v47  ;;  %v1496_v32 = vpop.eup %1495  ;;  %v731_v61 = vadd.f32 1.0, %v1494_v51 }
 0x13a   : > { %v575_v12 = vmul.f32 %v543_v5, %v2079_v43  ;;  %1032 = vmatmul.bf16.gmra.mxu3 %v816_v53  ;;  %1497 = vtanh.f32 %v669_v48  ;;  %v732_v0 = vadd.f32 1.0, %v1496_v32 }
 0x13b   : > { %v576_v52 = vmul.f32 %v544_v49, %v2085_v30  ;;  %1499 = vtanh.f32 %v670_v50  ;;  %v763_v9 = vmul.f32 0.5, %v731_v61 }
 0x13c   : > { %v607_v57 = vmul.f32 0.044715, %v575_v12  ;;  %v764_v14 = vmul.f32 0.5, %v732_v0 }
 0x13d   : > { %v608_v58 = vmul.f32 0.044715, %v576_v52  ;;  %v462_v59 = vpop.f32.mrf.mxu0  ;;  %v795_v21 = vmul.f32 %v763_v9, %v2047_v54 }
 0x13e   : > { %v639_v63 = vadd.f32 %v607_v57, %v2079_v43  ;;  %v2095_v19 = vadd.f32 %v462_v59, %v1903_v23  ;;  %v511_v28 = vpop.f32.mrf.mxu1  ;;  %v796_v29 = vmul.f32 %v764_v14, %v2053_v62 }
 0x13f   : > { %v640_v1 = vadd.f32 %v608_v58, %v2085_v30  ;;  %v2099_v2 = vadd.f32 %v511_v28, %v1905_v24 }
 0x140   : > { %v1498_v3 = vpop.eup %1497  ;;  %v545_v26 = vmul.f32 %v2095_v19, %v2095_v19  ;;  %v671_v46 = vmul.f32 0.7978846, %v639_v63 }
 0x141   : > { %v1500_v4 = vpop.eup %1499  ;;  %v546_v7 = vmul.f32 %v2099_v2, %v2099_v2  ;;  %v733_v8 = vadd.f32 1.0, %v1498_v3  ;;  %v672_v11 = vmul.f32 0.7978846, %v640_v1 }
 0x142   : > { %v577_v13 = vmul.f32 %v545_v26, %v2095_v19  ;;  %v734_v55 = vadd.f32 1.0, %v1500_v4  ;;  %1501 = vtanh.f32 %v671_v46 }
 0x143   : > { %v578_v15 = vmul.f32 %v546_v7, %v2099_v2  ;;  %v765_v17 = vmul.f32 0.5, %v733_v8  ;;  %1503 = vtanh.f32 %v672_v11 }
 0x144   : > { %v609_v41 = vmul.f32 0.044715, %v577_v13  ;;  %v766_v60 = vmul.f32 0.5, %v734_v55 }
 0x145   : > { %v610_v18 = vmul.f32 0.044715, %v578_v15  ;;  %v465_v20 = vpop.f32.mrf.mxu0  ;;  %v797_v22 = vmul.f32 %v765_v17, %v2063_v35 }
 0x146   : > { %v641_v25 = vadd.f32 %v609_v41, %v2095_v19  ;;  %v2111_v27 = vadd.f32 %v465_v20, %v1903_v23  ;;  %v514_v6 = vpop.f32.mrf.mxu1  ;;  %v798_v31 = vmul.f32 %v766_v60, %v2067_v16 }
 0x147   : > { %v642_v33 = vadd.f32 %v610_v18, %v2099_v2  ;;  %v2117_v56 = vadd.f32 %v514_v6, %v1905_v24  ;;  %v817_v10 = vpack.c.bf16 %v797_v22, %v795_v21 }
 0x148   : > { %v547_v54 = vmul.f32 %v2111_v27, %v2111_v27  ;;  %v818_v35 = vpack.c.bf16 %v798_v31, %v796_v29  ;;  %v673_v34 = vmul.f32 0.7978846, %v641_v25  ;;  %v1502_v38 = vpop.eup %1501 }
 0x149   : > { %v548_v36 = vmul.f32 %v2117_v56, %v2117_v56  ;;  %988 = vmatmul.bf16.gmra.mxu2 %v817_v10  ;;  %v674_v37 = vmul.f32 0.7978846, %v642_v33  ;;  %v1504_v16 = vpop.eup %1503  ;;  %v735_v47 = vadd.f32 1.0, %v1502_v38 }
 0x14a   : > { %v579_v62 = vmul.f32 %v547_v54, %v2111_v27  ;;  %1037 = vmatmul.bf16.gmra.mxu3 %v818_v35  ;;  %1505 = vtanh.f32 %v673_v34  ;;  %v736_v48 = vadd.f32 1.0, %v1504_v16  ;;  %v2138_v35 = vld [vmem:[%s2214_s4] ss:$0 sm:$0xff] }
 0x14b   : > { %v580_v40 = vmul.f32 %v548_v36, %v2117_v56  ;;  %1507 = vtanh.f32 %v674_v37  ;;  %v767_v59 = vmul.f32 0.5, %v735_v47 }
 0x14c   : > { %v611_v39 = vmul.f32 0.044715, %v579_v62  ;;  %v768_v0 = vmul.f32 0.5, %v736_v48 }
 0x14d   : > { %v612_v44 = vmul.f32 0.044715, %v580_v40  ;;  %v467_v45 = vpop.f32.mrf.mxu0  ;;  %v799_v4 = vmul.f32 %v767_v59, %v2079_v43 }
 0x14e   : > { %v643_v42 = vadd.f32 %v611_v39, %v2111_v27  ;;  %v468_v5 = vadd.f32 %v467_v45, %v1903_v23  ;;  %v516_v53 = vpop.f32.mrf.mxu1  ;;  %v800_v8 = vmul.f32 %v768_v0, %v2085_v30 }
 0x14f   : > { %v644_v49 = vadd.f32 %v612_v44, %v2117_v56  ;;  %v517_v50 = vadd.f32 %v516_v53, %v1905_v24 }
 0x150   : > { %v1506_v51 = vpop.eup %1505  ;;  %v549_v12 = vmul.f32 %v468_v5, %v468_v5  ;;  %v675_v32 = vmul.f32 0.7978846, %v643_v42 }
 0x151   : > { %v1508_v52 = vpop.eup %1507  ;;  %v550_v57 = vmul.f32 %v517_v50, %v517_v50  ;;  %v737_v58 = vadd.f32 1.0, %v1506_v51  ;;  %v676_v61 = vmul.f32 0.7978846, %v644_v49 }
 0x152   : > { %v581_v63 = vmul.f32 %v549_v12, %v468_v5  ;;  %v738_v28 = vadd.f32 1.0, %v1508_v52  ;;  %1509 = vtanh.f32 %v675_v32 }
 0x153   : > { %v582_v1 = vmul.f32 %v550_v57, %v517_v50  ;;  %v769_v3 = vmul.f32 0.5, %v737_v58  ;;  %1511 = vtanh.f32 %v676_v61 }
 0x154   : > { %v613_v23 = vmul.f32 0.044715, %v581_v63  ;;  %v770_v26 = vmul.f32 0.5, %v738_v28 }
 0x155   : > { %v614_v46 = vmul.f32 0.044715, %v582_v1  ;;  %v801_v24 = vmul.f32 %v769_v3, %v2095_v19 }
 0x156   : > { %v645_v7 = vadd.f32 %v613_v23, %v468_v5  ;;  %v802_v9 = vmul.f32 %v770_v26, %v2099_v2 }
 0x157   : > { %v646_v11 = vadd.f32 %v614_v46, %v517_v50  ;;  %v819_v13 = vpack.c.bf16 %v801_v24, %v799_v4 }
 0x158   : > { %v820_v55 = vpack.c.bf16 %v802_v9, %v800_v8  ;;  %v677_v14 = vmul.f32 0.7978846, %v645_v7  ;;  %v1510_v17 = vpop.eup %1509 }
 0x159   : > { %993 = vmatmul.bf16.gmra.mxu2 %v819_v13  ;;  %v678_v15 = vmul.f32 0.7978846, %v646_v11  ;;  %v1512_v41 = vpop.eup %1511  ;;  %v739_v43 = vadd.f32 1.0, %v1510_v17 }
 0x15a   : > { %1042 = vmatmul.bf16.gmra.mxu3 %v820_v55  ;;  %1513 = vtanh.f32 %v677_v14  ;;  %v740_v60 = vadd.f32 1.0, %v1512_v41 }
 0x15b   : > { %1515 = vtanh.f32 %v678_v15  ;;  %v771_v21 = vmul.f32 0.5, %v739_v43 }
 0x15c   : > { %v772_v22 = vmul.f32 0.5, %v740_v60 }
 0x15d   : > { %v803_v6 = vmul.f32 %v771_v21, %v2111_v27 }
 0x15e   : > { %v804_v31 = vmul.f32 %v772_v22, %v2117_v56 }
 0x160   : > { %v1514_v19 = vpop.eup %1513 }
 0x161   : > { %v1516_v18 = vpop.eup %1515  ;;  %v741_v20 = vadd.f32 1.0, %v1514_v19 }
 0x162   : > { %v742_v30 = vadd.f32 1.0, %v1516_v18 }
 0x163   : > { %v773_v2 = vmul.f32 0.5, %v741_v20 }
 0x164   : > { %v774_v25 = vmul.f32 0.5, %v742_v30 }
 0x165   : > { %v805_v29 = vmul.f32 %v773_v2, %v468_v5 }
 0x166   : > { %v806_v33 = vmul.f32 %v774_v25, %v517_v50 }
 0x167   : > { %v821_v10 = vpack.c.bf16 %v805_v29, %v803_v6 }
 0x168   : > { %v822_v54 = vpack.c.bf16 %v806_v33, %v804_v31 }
 0x169   : > { %998 = vmatmul.bf16.gmra.mxu2 %v821_v10 }
 0x16a   : > { %1047 = vmatmul.bf16.gmra.mxu3 %v822_v54 }
 0x17c   : > { %v964_v34 = vpop.f32.mrf.mxu2 }
 0x17d   : > { %v965_v36 = vadd.f32 %v2138_v35, %v964_v34  ;;  %v1013_v37 = vpop.f32.mrf.mxu3 }
 0x17f   : > { %v1014_v38 = vadd.f32 %v1013_v37, %v965_v36 }
 0x181   : > { %1053 = vst [vmem:[%s2143_s12] sm:$0xff] %v1014_v38 }
 0x184   : > { %v966_v27 = vpop.f32.mrf.mxu2 }
 0x185   : > { %v967_v56 = vadd.f32 %v2138_v35, %v966_v27  ;;  %v1015_v62 = vpop.f32.mrf.mxu3 }
 0x187   : > { %v1016_v16 = vadd.f32 %v1015_v62, %v967_v56 }
 0x189   : > { %1054 = vst [vmem:[%s2143_s12 + $0x8] sm:$0xff] %v1016_v16 }
 0x18c   : > { %v969_v40 = vpop.f32.mrf.mxu2 }
 0x18d   : > { %v970_v39 = vadd.f32 %v2138_v35, %v969_v40  ;;  %v1018_v44 = vpop.f32.mrf.mxu3 }
 0x18f   : > { %v1019_v45 = vadd.f32 %v1018_v44, %v970_v39 }
 0x191   : > { %1055 = vst [vmem:[%s2143_s12 + $0x10] sm:$0xff] %v1019_v45 }
 0x194   : > { %v971_v47 = vpop.f32.mrf.mxu2 }
 0x195   : > { %v972_v42 = vadd.f32 %v2138_v35, %v971_v47  ;;  %v1020_v5 = vpop.f32.mrf.mxu3 }
 0x197   : > { %v1021_v53 = vadd.f32 %v1020_v5, %v972_v42 }
 0x199   : > { %1056 = vst [vmem:[%s2143_s12 + $0x18] sm:$0xff] %v1021_v53 }
 0x19c   : > { %v974_v48 = vpop.f32.mrf.mxu2 }
 0x19d   : > { %v975_v49 = vadd.f32 %v2138_v35, %v974_v48  ;;  %v1023_v50 = vpop.f32.mrf.mxu3 }
 0x19f   : > { %v1024_v51 = vadd.f32 %v1023_v50, %v975_v49 }
 0x1a1   : > { %1057 = vst [vmem:[%s2143_s12 + $0x20] sm:$0xff] %v1024_v51 }
 0x1a4   : > { %v976_v12 = vpop.f32.mrf.mxu2 }
 0x1a5   : > { %v977_v32 = vadd.f32 %v2138_v35, %v976_v12  ;;  %v1025_v52 = vpop.f32.mrf.mxu3 }
 0x1a7   : > { %v1026_v57 = vadd.f32 %v1025_v52, %v977_v32 }
 0x1a9   : > { %1058 = vst [vmem:[%s2143_s12 + $0x28] sm:$0xff] %v1026_v57 }
 0x1ac   : > { %v979_v58 = vpop.f32.mrf.mxu2 }
 0x1ad   : > { %v980_v59 = vadd.f32 %v2138_v35, %v979_v58  ;;  %v1028_v61 = vpop.f32.mrf.mxu3 }
 0x1af   : > { %v1029_v63 = vadd.f32 %v1028_v61, %v980_v59 }
 0x1b1   : > { %1059 = vst [vmem:[%s2143_s12 + $0x30] sm:$0xff] %v1029_v63 }
 0x1b4   : > { %v981_v28 = vpop.f32.mrf.mxu2 }
 0x1b5   : > { %v982_v0 = vadd.f32 %v2138_v35, %v981_v28  ;;  %v1030_v1 = vpop.f32.mrf.mxu3 }
 0x1b7   : > { %v1031_v3 = vadd.f32 %v1030_v1, %v982_v0 }
 0x1b9   : > { %1060 = vst [vmem:[%s2143_s12 + $0x38] sm:$0xff] %v1031_v3 }
 0x1bc   : > { %v984_v23 = vpop.f32.mrf.mxu2 }
 0x1bd   : > { %v985_v26 = vadd.f32 %v2138_v35, %v984_v23  ;;  %v1033_v46 = vpop.f32.mrf.mxu3 }
 0x1bf   : > { %v1034_v4 = vadd.f32 %v1033_v46, %v985_v26 }
 0x1c1   : > { %1061 = vst [vmem:[%s2143_s12 + $0x40] sm:$0xff] %v1034_v4 }
 0x1c4   : > { %v986_v24 = vpop.f32.mrf.mxu2 }
 0x1c5   : > { %v987_v7 = vadd.f32 %v2138_v35, %v986_v24  ;;  %v1035_v8 = vpop.f32.mrf.mxu3 }
 0x1c7   : > { %v1036_v9 = vadd.f32 %v1035_v8, %v987_v7 }
 0x1c9   : > { %1062 = vst [vmem:[%s2143_s12 + $0x48] sm:$0xff] %v1036_v9 }
 0x1cc   : > { %v989_v11 = vpop.f32.mrf.mxu2 }
 0x1cd   : > { %v990_v13 = vadd.f32 %v2138_v35, %v989_v11  ;;  %v1038_v55 = vpop.f32.mrf.mxu3 }
 0x1cf   : > { %v1039_v14 = vadd.f32 %v1038_v55, %v990_v13 }
 0x1d1   : > { %1063 = vst [vmem:[%s2143_s12 + $0x50] sm:$0xff] %v1039_v14 }
 0x1d4   : > { %v991_v15 = vpop.f32.mrf.mxu2 }
 0x1d5   : > { %v992_v17 = vadd.f32 %v2138_v35, %v991_v15  ;;  %v1040_v41 = vpop.f32.mrf.mxu3 }
 0x1d7   : > { %v1041_v43 = vadd.f32 %v1040_v41, %v992_v17 }
 0x1d9   : > { %1064 = vst [vmem:[%s2143_s12 + $0x58] sm:$0xff] %v1041_v43 }
 0x1dc   : > { %v994_v60 = vpop.f32.mrf.mxu2 }
 0x1dd   : > { %v995_v19 = vadd.f32 %v2138_v35, %v994_v60  ;;  %v1043_v18 = vpop.f32.mrf.mxu3 }
 0x1df   : > { %v1044_v20 = vadd.f32 %v1043_v18, %v995_v19 }
 0x1e1   : > { %1065 = vst [vmem:[%s2143_s12 + $0x60] sm:$0xff] %v1044_v20 }
 0x1e4   : > { %v996_v21 = vpop.f32.mrf.mxu2 }
 0x1e5   : > { %v997_v30 = vadd.f32 %v2138_v35, %v996_v21  ;;  %v1045_v22 = vpop.f32.mrf.mxu3 }
 0x1e7   : > { %v1046_v2 = vadd.f32 %v1045_v22, %v997_v30 }
 0x1e9   : > { %1066 = vst [vmem:[%s2143_s12 + $0x68] sm:$0xff] %v1046_v2 }
 0x1ec   : > { %v999_v25 = vpop.f32.mrf.mxu2 }
 0x1ed   : > { %v1000_v6 = vadd.f32 %v2138_v35, %v999_v25  ;;  %v1048_v29 = vpop.f32.mrf.mxu3 }
 0x1ef   : > { %v1049_v31 = vadd.f32 %v1048_v29, %v1000_v6 }
 0x1f1   : > { %1067 = vst [vmem:[%s2143_s12 + $0x70] sm:$0xff] %v1049_v31 }
 0x1f4   : > { %v1001_v33 = vpop.f32.mrf.mxu2 }
 0x1f5   : > { %v1002_v10 = vadd.f32 %v2138_v35, %v1001_v33  ;;  %v1050_v54 = vpop.f32.mrf.mxu3 }
 0x1f7   : > { %v1051_v34 = vadd.f32 %v1050_v54, %v1002_v10 }
 0x1f9   : > { %1068 = vst [vmem:[%s2143_s12 + $0x78] sm:$0xff] %v1051_v34 }
 0x1fa   : > { %1664 = shalt.err (!%p1661_p10)
}
 0x1fb   : > { %s1720_s26 = smov 128   ;;  %s1721_s29 = smov 8  }
 0x1fc   : > { %1383 = dma.vmem_to_hbm [thread:$0]  (%p1837_p3), %s1083_s15, 2048, %s1085_s7, %s1070_s16, %s1720_s26, %s1720_s26, %s1721_s29  }
 0x1fd PF: > { %s1099_s12 = sand.u32 1, %s1699_s18   ;;  %p2224_p12 = scmp.ge.s32.totalorder %s1711_s21, 2 }
 0x1fe   : > { %s1100_s23 = scalar_lea.sflag [#allocation4], %s1099_s12 }
 0x1ff   : > { %p1400_p13 = pnand %p2224_p12, %p1787_p6 }
 0x201   : > { %p1401_p0 = pneg %p1400_p13 }
 0x203   : > { %1694 = dma.done.wait (%p1401_p0), %s1100_s23, 2048  }
 0x204   : > { %1696 = vsyncadd (%p1401_p0), %s1100_s23, 4294965248  ;;  %p20_p5 = scmp.ge.s32.totalorder %s1824_s30, 4   ;;  %s2225_s18 = smov %s1703_s19 }
 0x205   : > { %s2226_s19 = smov %s1707_s20  ;;  %s2227_s20 = smov %s1833_s9 }
 0x206   : > { %s2228_s21 = smov %s1824_s30  ;;  %22 = sbr.rel (!%p20_p5) target bundleno = 7 (0x7), region = 97 }
 0x20b   :  { %1106 = vsyncpa [#allocation3], 1 }
 0x20c   :  { %1108 = vsyncpa [#allocation3 + $0x1], 1 }
 0x20d   :  { %1109 = vsyncpa [#allocation6], 1 }
 0x20e   :  { %1110 = vsyncpa [#allocation9], 1 }
 0x20f   :  { %1111 = vsyncpa [#allocation4], 1 }
 0x210   :  { %1113 = vsyncpa [#allocation4 + $0x1], 1 }

</bundles_post_ra>
